<compile_context>
chip_gen: v5e
topology: v5e:2x2
jax: 0.10.0
libtpu: 0.0.40
codegen_flags: <defaults>
</compile_context>

<pallas_src>
import functools

import jax
import jax.numpy as jnp
from jax.experimental import pallas as pl
from jax.experimental.pallas import tpu as pltpu


def _round_up(n, m):
    return ((n + m - 1) // m) * m


def _probe_kernel(y_ref, *refs, num_heads, n_steps):
    """One grid step == one TensorCore's share of probing heads.

    y_ref          : (B, 1)  int32   labels (shared, DMA'd per step)
    refs[3h + 0]   : (B, D_h) f32    representation of head h
    refs[3h + 1]   : (D_h, C_h) f32  pre-transposed Linear weight (in, out)
    refs[3h + 2]   : (1, C_h)  f32   Linear bias
    refs[-1]       : (rows, 128) f32 output block for this step
                     sublane h : [loss_h, acc_h, 0, ...]  (owned heads only)
                     sublane H : [sum(own losses)/H, sum(own accs)/H, 0, ...]
    """
    out_ref = refs[-1]
    B = y_ref.shape[0]
    inv_b = 1.0 / float(B)
    inv_h = 1.0 / float(num_heads)

    y = y_ref[...]                                                  # (B, 1) i32
    lane = jax.lax.broadcasted_iota(jnp.int32, (1, 128), 1)
    lane0 = (lane == 0).astype(jnp.float32)
    lane1 = (lane == 1).astype(jnp.float32)

    # Zero the whole block once: unowned head rows and padding rows stay 0 so
    # the cross-step merge (sum) in the wrapper is exact.
    out_ref[...] = jnp.zeros_like(out_ref)
    step = pl.program_id(0)

    for h in range(num_heads):
        x_ref = refs[3 * h + 0]
        w_ref = refs[3 * h + 1]
        b_ref = refs[3 * h + 2]

        def compute_head(h=h, x_ref=x_ref, w_ref=w_ref, b_ref=b_ref):
            x = jnp.maximum(x_ref[...], 0.0)                        # relu (B, D)
            # Canonical (M,K)x(K,N): weight was pre-transposed to (D, C).
            logits = jax.lax.dot_general(
                x, w_ref[...], (((1,), (0,)), ((), ())),
                preferred_element_type=jnp.float32) + b_ref[...]    # (B, C)
            Bc, C = logits.shape

            # --- cross entropy, mean over batch (torch CrossEntropyLoss) ---
            m = jnp.max(logits, axis=-1, keepdims=True)             # (B, 1)
            lse = m + jnp.log(
                jnp.sum(jnp.exp(logits - m), axis=-1, keepdims=True))
            cls = jax.lax.broadcasted_iota(jnp.int32, (Bc, C), 1)
            onehot = (cls == y).astype(jnp.float32)
            true_logit = jnp.sum(logits * onehot, axis=-1, keepdims=True)
            loss = jnp.sum(lse - true_logit, keepdims=True) * inv_b  # (1, 1)

            # --- accuracy: first-index argmax (torch.argmax tie-breaking) ---
            first_max = jnp.min(
                jnp.where(logits == m, cls, jnp.int32(C)),
                axis=-1, keepdims=True)                              # (B, 1)
            correct = (first_max == y).astype(jnp.float32)
            acc = jnp.sum(correct, keepdims=True) * inv_b            # (1, 1)

            # lane-dense row for this head
            out_ref[pl.ds(h, 1), :] = loss * lane0 + acc * lane1     # (1, 128)

        if n_steps == 1:
            compute_head()
        else:
            pl.when(step == (h % n_steps))(compute_head)

    # Overall means: unowned head rows (and row `num_heads` itself) are still
    # zero, so summing the block gives this step's partial sum; dividing by H
    # and summing across steps in the wrapper yields the exact overall mean.
    head_rows = out_ref[...]                                         # (rows, 128)
    out_ref[pl.ds(num_heads, 1), :] = (
        jnp.sum(head_rows, axis=0, keepdims=True) * inv_h)


def prepare_head_params(heads):
    """One-time (outside the eval loop) conversion of torch-layout heads.

    torch.nn.Linear stores weight as (C, D); pre-transpose to (D, C) so the
    kernel's dot_general is canonical (M,K)x(K,N), and reshape bias to (1, C).
    The returned device arrays persist across eval steps — no per-call glue.
    """
    params = []
    for (w, b) in heads:
        w_t = jnp.asarray(jnp.asarray(w, jnp.float32).T)             # (D, C)
        b2 = jnp.asarray(b, jnp.float32)[None, :]                    # (1, C)
        params.append((w_t, b2))
    return params


def linear_probing_forward(reprs, y_true, head_params, evaluators=None):
    """reprs: list of (B, D_h) f32; head_params: list of (w_t:(D_h,C_h), b:(1,C_h));
    y_true: (B,) int.  Returns the evaluators dict (per-head + overall loss/acc)."""
    H = len(head_params)
    assert H >= 1 and len(reprs) == H
    B = int(reprs[0].shape[0])

    n_steps = min(2, H)               # 2-way parallel head split for v7x's 2 TCs
    rows = _round_up(H + 1, 8)        # head rows + overall row, sublane aligned

    y2 = jnp.asarray(y_true, jnp.int32).reshape(B, 1)

    in_specs = [pl.BlockSpec((B, 1), lambda i: (0, 0))]
    args = [y2]
    for x, (w_t, b) in zip(reprs, head_params):
        D = int(x.shape[1])
        C = int(w_t.shape[1])
        in_specs += [
            pl.BlockSpec((B, D), lambda i: (0, 0)),
            pl.BlockSpec((D, C), lambda i: (0, 0)),
            pl.BlockSpec((1, C), lambda i: (0, 0)),
        ]
        args += [jnp.asarray(x, jnp.float32), w_t, b]

    out = pl.pallas_call(
        functools.partial(_probe_kernel, num_heads=H, n_steps=n_steps),
        out_shape=jax.ShapeDtypeStruct((n_steps, rows, 128), jnp.float32),
        grid_spec=pltpu.PrefetchScalarGridSpec(
            num_scalar_prefetch=0,
            grid=(n_steps,),
            in_specs=in_specs,
            out_specs=pl.BlockSpec((None, rows, 128), lambda i: (i, 0, 0)),
        ),
        compiler_params=pltpu.CompilerParams(
            dimension_semantics=("parallel",)),
    )(*args)

    # Merge the per-core blocks; unowned rows are zero so a sum is exact.
    merged = out[0] if n_steps == 1 else jnp.sum(out, axis=0)        # (rows, 128)

    if evaluators is None:
        evaluators = {}
    for h in range(H):
        evaluators[f"linear_probing/accuracy_{h}"] = merged[h, 1]
        evaluators[f"linear_probing/loss_{h}"] = merged[h, 0]
    evaluators["linear_probing/accuracy_overall"] = merged[H, 1]
    evaluators["linear_probing/loss_overall"] = merged[H, 0]
    return evaluators


def init_linear(key, in_dim, out_dim):
    """Deterministic torch.nn.Linear-style init: U(-1/sqrt(in), 1/sqrt(in))."""
    kw, kb = jax.random.split(key)
    bound = 1.0 / jnp.sqrt(jnp.float32(in_dim))
    w = jax.random.uniform(kw, (out_dim, in_dim), jnp.float32, -bound, bound)
    b = jax.random.uniform(kb, (out_dim,), jnp.float32, -bound, bound)
    return w, b


if __name__ == "__main__":
    key = jax.random.PRNGKey(0)
    B = 8
    input_dims = (32, 64)      # per-head representation dims
    output_dims = (10, 10)     # per-head number of classes

    # Deterministic synthetic heads and representations.
    k_heads, k_reps, k_y = jax.random.split(key, 3)
    head_keys = jax.random.split(k_heads, len(input_dims))
    heads = [
        init_linear(head_keys[i], input_dims[i], output_dims[i])
        for i in range(len(input_dims))
    ]
    rep_keys = jax.random.split(k_reps, len(input_dims))
    reprs = [
        jax.random.normal(rep_keys[i], (B, input_dims[i]), jnp.float32)
        for i in range(len(input_dims))
    ]
    y_true = jax.random.randint(k_y, (B,), 0, output_dims[0], jnp.int32)

    # Heads are prepared once (pre-transposed weights) outside the eval loop.
    head_params = prepare_head_params(heads)

    evaluators = linear_probing_forward(reprs, y_true, head_params)
    jax.block_until_ready(evaluators)

    # quick sanity check against plain-JAX reference
    ref_losses, ref_accs = [], []
    for i, ((w, b), rep) in enumerate(zip(heads, reprs)):
        r = jnp.maximum(rep, 0.0)
        logits = r @ w.T + b
        ref_loss = jnp.mean(
            jax.nn.logsumexp(logits, axis=-1)
            - jnp.take_along_axis(logits, y_true[:, None], axis=-1)[:, 0]
        )
        ref_acc = jnp.mean((jnp.argmax(logits, axis=-1) == y_true).astype(jnp.float32))
        ref_losses.append(ref_loss)
        ref_accs.append(ref_acc)
        assert jnp.allclose(evaluators[f"linear_probing/loss_{i}"], ref_loss, atol=1e-4)
        assert jnp.allclose(evaluators[f"linear_probing/accuracy_{i}"], ref_acc, atol=1e-6)
    assert jnp.allclose(evaluators["linear_probing/loss_overall"],
                        sum(ref_losses) / len(ref_losses), atol=1e-4)
    assert jnp.allclose(evaluators["linear_probing/accuracy_overall"],
                        sum(ref_accs) / len(ref_accs), atol=1e-6)

    print("KERNEL_OK")
</pallas_src>

<mosaic_0001>
module attributes {stable_mosaic.version = 11 : i64} {
  func.func @_probe_kernel(%arg0: i32, %arg1: memref<8x1xi32, #tpu.memory_space<vmem>>, %arg2: memref<8x32xf32, #tpu.memory_space<vmem>>, %arg3: memref<32x10xf32, #tpu.memory_space<vmem>>, %arg4: memref<1x10xf32, #tpu.memory_space<vmem>>, %arg5: memref<8x64xf32, #tpu.memory_space<vmem>>, %arg6: memref<64x10xf32, #tpu.memory_space<vmem>>, %arg7: memref<1x10xf32, #tpu.memory_space<vmem>>, %arg8: memref<1x8x128xf32, #tpu.memory_space<vmem>>) attributes {dimension_semantics = [#tpu.dimension_semantics<parallel>], iteration_bounds = array<i64: 2>, scalar_prefetch = 0 : i64, scratch_operands = 0 : i64, tpu.core_type = #tpu.core_type<tc>, window_params = [{pipeline_mode = #tpu.pipeline_mode<synchronous>, transform_indices = @transform_0, window_bounds = array<i64: 8, 1>}, {pipeline_mode = #tpu.pipeline_mode<synchronous>, transform_indices = @transform_1, window_bounds = array<i64: 8, 32>}, {pipeline_mode = #tpu.pipeline_mode<synchronous>, transform_indices = @transform_2, window_bounds = array<i64: 32, 10>}, {pipeline_mode = #tpu.pipeline_mode<synchronous>, transform_indices = @transform_3, window_bounds = array<i64: 1, 10>}, {pipeline_mode = #tpu.pipeline_mode<synchronous>, transform_indices = @transform_4, window_bounds = array<i64: 8, 64>}, {pipeline_mode = #tpu.pipeline_mode<synchronous>, transform_indices = @transform_5, window_bounds = array<i64: 64, 10>}, {pipeline_mode = #tpu.pipeline_mode<synchronous>, transform_indices = @transform_6, window_bounds = array<i64: 1, 10>}, {transform_indices = @transform_7, window_bounds = array<i64: 1, 8, 128>}]} {
    %c0 = arith.constant 0 : index
    %c0_0 = arith.constant 0 : index
    %0 = vector.load %arg1[%c0, %c0_0] : memref<8x1xi32, #tpu.memory_space<vmem>>, vector<8x1xi32>
    %1 = tpu.iota {dimensions = array<i32: 1>} : vector<1x128xi32>
    %c0_i32 = arith.constant 0 : i32
    %2 = vector.broadcast %c0_i32 : i32 to vector<1x128xi32>
    %3 = arith.cmpi eq, %1, %2 : vector<1x128xi32>
    %4 = arith.extui %3 : vector<1x128xi1> to vector<1x128xi32>
    %5 = arith.sitofp %4 : vector<1x128xi32> to vector<1x128xf32>
    %c1_i32 = arith.constant 1 : i32
    %6 = vector.broadcast %c1_i32 : i32 to vector<1x128xi32>
    %7 = arith.cmpi eq, %1, %6 : vector<1x128xi32>
    %8 = arith.extui %7 : vector<1x128xi1> to vector<1x128xi32>
    %9 = arith.sitofp %8 : vector<1x128xi32> to vector<1x128xf32>
    %cst = arith.constant 0.000000e+00 : f32
    %10 = vector.broadcast %cst : f32 to vector<8x128xf32>
    %c0_1 = arith.constant 0 : index
    %c0_2 = arith.constant 0 : index
    %c0_3 = arith.constant 0 : index
    %11 = vector.load %arg8[%c0_1, %c0_2, %c0_3] : memref<1x8x128xf32, #tpu.memory_space<vmem>>, vector<1x8x128xf32>
    %12 = vector.shape_cast %11 : vector<1x8x128xf32> to vector<8x128xf32>
    %13 = vector.shape_cast %10 : vector<8x128xf32> to vector<1x8x128xf32>
    tpu.vector_store %arg8[%c0_1, %c0_2, %c0_3], %13 {strides = array<i32>} : memref<1x8x128xf32, #tpu.memory_space<vmem>>, vector<1x8x128xf32>,
    %c0_i32_4 = arith.constant 0 : i32
    %14 = arith.cmpi eq, %arg0, %c0_i32_4 : i32
    %15 = arith.extui %14 : i1 to i32
    %c0_i32_5 = arith.constant 0 : i32
    %16 = arith.cmpi ne, %15, %c0_i32_5 : i32
    scf.if %16 {
      %c0_15 = arith.constant 0 : index
      %c0_16 = arith.constant 0 : index
      %29 = vector.load %arg2[%c0_15, %c0_16] : memref<8x32xf32, #tpu.memory_space<vmem>>, vector<8x32xf32>
      %cst_17 = arith.constant 0.000000e+00 : f32
      %30 = vector.broadcast %cst_17 : f32 to vector<8x32xf32>
      %31 = arith.maximumf %29, %30 : vector<8x32xf32>
      %c0_18 = arith.constant 0 : index
      %c0_19 = arith.constant 0 : index
      %32 = vector.load %arg3[%c0_18, %c0_19] : memref<32x10xf32, #tpu.memory_space<vmem>>, vector<32x10xf32>
      %cst_20 = arith.constant dense<0.000000e+00> : vector<8x10xf32>
      %33 = tpu.matmul %31, %32, %cst_20 {dimension_numbers = #tpu.dot_dimension_numbers<[1], [0], [0], [1], [0, 0, 1, 1], [], []>} : vector<8x32xf32>, vector<32x10xf32>, vector<8x10xf32> -> vector<8x10xf32>
      %c0_21 = arith.constant 0 : index
      %c0_22 = arith.constant 0 : index
      %34 = vector.load %arg4[%c0_21, %c0_22] : memref<1x10xf32, #tpu.memory_space<vmem>>, vector<1x10xf32>
      %35 = vector.broadcast %34 : vector<1x10xf32> to vector<8x10xf32>
      %36 = arith.addf %33, %35 : vector<8x10xf32>
      %cst_23 = arith.constant dense<0xFF800000> : vector<8xf32>
      %37 = vector.multi_reduction <maximumf>, %36, %cst_23 [1] : vector<8x10xf32> to vector<8xf32>
      %38 = vector.shape_cast %37 : vector<8xf32> to vector<8x1xf32>
      %39 = vector.broadcast %38 : vector<8x1xf32> to vector<8x10xf32>
      %40 = arith.subf %36, %39 : vector<8x10xf32>
      %41 = math.exp %40 : vector<8x10xf32>
      %cst_24 = arith.constant dense<0.000000e+00> : vector<8xf32>
      %42 = vector.multi_reduction <add>, %41, %cst_24 [1] : vector<8x10xf32> to vector<8xf32>
      %43 = vector.shape_cast %42 : vector<8xf32> to vector<8x1xf32>
      %44 = math.log %43 : vector<8x1xf32>
      %45 = arith.addf %38, %44 : vector<8x1xf32>
      %46 = tpu.iota {dimensions = array<i32: 1>} : vector<8x10xi32>
      %47 = vector.broadcast %0 : vector<8x1xi32> to vector<8x10xi32>
      %48 = arith.cmpi eq, %46, %47 : vector<8x10xi32>
      %49 = arith.extui %48 : vector<8x10xi1> to vector<8x10xi32>
      %50 = arith.sitofp %49 : vector<8x10xi32> to vector<8x10xf32>
      %51 = arith.mulf %36, %50 : vector<8x10xf32>
      %cst_25 = arith.constant dense<0.000000e+00> : vector<8xf32>
      %52 = vector.multi_reduction <add>, %51, %cst_25 [1] : vector<8x10xf32> to vector<8xf32>
      %53 = vector.shape_cast %52 : vector<8xf32> to vector<8x1xf32>
      %54 = arith.subf %45, %53 : vector<8x1xf32>
      %55 = vector.shape_cast %54 : vector<8x1xf32> to vector<1x8x1xf32>
      %cst_26 = arith.constant dense<0.000000e+00> : vector<1xf32>
      %56 = vector.multi_reduction <add>, %55, %cst_26 [1, 2] : vector<1x8x1xf32> to vector<1xf32>
      %57 = vector.shape_cast %56 : vector<1xf32> to vector<1x1x1xf32>
      %58 = vector.extract %57[0, 0, 0] : f32 from vector<1x1x1xf32>
      %59 = vector.broadcast %58 : f32 to vector<1x1xf32>
      %cst_27 = arith.constant 1.250000e-01 : f32
      %60 = vector.broadcast %cst_27 : f32 to vector<1x1xf32>
      %61 = arith.mulf %59, %60 : vector<1x1xf32>
      %62 = vector.broadcast %38 : vector<8x1xf32> to vector<8x10xf32>
      %63 = arith.cmpf oeq, %36, %62 : vector<8x10xf32>
      %c10_i32 = arith.constant 10 : i32
      %64 = vector.broadcast %c10_i32 : i32 to vector<8x10xi32>
      %65 = arith.select %63, %46, %64 : vector<8x10xi1>, vector<8x10xi32>
      %cst_28 = arith.constant dense<2147483647> : vector<8xi32>
      %66 = vector.multi_reduction <minsi>, %65, %cst_28 [1] : vector<8x10xi32> to vector<8xi32>
      %67 = vector.shape_cast %66 : vector<8xi32> to vector<8x1xi32>
      %68 = arith.cmpi eq, %67, %0 : vector<8x1xi32>
      %69 = arith.extui %68 : vector<8x1xi1> to vector<8x1xi32>
      %70 = arith.sitofp %69 : vector<8x1xi32> to vector<8x1xf32>
      %71 = vector.shape_cast %70 : vector<8x1xf32> to vector<1x8x1xf32>
      %cst_29 = arith.constant dense<0.000000e+00> : vector<1xf32>
      %72 = vector.multi_reduction <add>, %71, %cst_29 [1, 2] : vector<1x8x1xf32> to vector<1xf32>
      %73 = vector.shape_cast %72 : vector<1xf32> to vector<1x1x1xf32>
      %74 = vector.extract %73[0, 0, 0] : f32 from vector<1x1x1xf32>
      %75 = vector.broadcast %74 : f32 to vector<1x1xf32>
      %cst_30 = arith.constant 1.250000e-01 : f32
      %76 = vector.broadcast %cst_30 : f32 to vector<1x1xf32>
      %77 = arith.mulf %75, %76 : vector<1x1xf32>
      %78 = vector.broadcast %61 : vector<1x1xf32> to vector<1x128xf32>
      %79 = arith.mulf %78, %5 : vector<1x128xf32>
      %80 = vector.broadcast %77 : vector<1x1xf32> to vector<1x128xf32>
      %81 = arith.mulf %80, %9 : vector<1x128xf32>
      %82 = arith.addf %79, %81 : vector<1x128xf32>
      %c0_31 = arith.constant 0 : index
      %c0_32 = arith.constant 0 : index
      %c0_33 = arith.constant 0 : index
      %83 = vector.load %arg8[%c0_31, %c0_32, %c0_33] : memref<1x8x128xf32, #tpu.memory_space<vmem>>, vector<1x1x128xf32>
      %84 = vector.shape_cast %83 : vector<1x1x128xf32> to vector<1x128xf32>
      %85 = vector.shape_cast %82 : vector<1x128xf32> to vector<1x1x128xf32>
      tpu.vector_store %arg8[%c0_31, %c0_32, %c0_33], %85 {strides = array<i32>} : memref<1x8x128xf32, #tpu.memory_space<vmem>>, vector<1x1x128xf32>,
    } else {
    }
    %c1_i32_6 = arith.constant 1 : i32
    %17 = arith.cmpi eq, %arg0, %c1_i32_6 : i32
    %18 = arith.extui %17 : i1 to i32
    %c0_i32_7 = arith.constant 0 : i32
    %19 = arith.cmpi ne, %18, %c0_i32_7 : i32
    scf.if %19 {
      %c0_15 = arith.constant 0 : index
      %c0_16 = arith.constant 0 : index
      %29 = vector.load %arg5[%c0_15, %c0_16] : memref<8x64xf32, #tpu.memory_space<vmem>>, vector<8x64xf32>
      %cst_17 = arith.constant 0.000000e+00 : f32
      %30 = vector.broadcast %cst_17 : f32 to vector<8x64xf32>
      %31 = arith.maximumf %29, %30 : vector<8x64xf32>
      %c0_18 = arith.constant 0 : index
      %c0_19 = arith.constant 0 : index
      %32 = vector.load %arg6[%c0_18, %c0_19] : memref<64x10xf32, #tpu.memory_space<vmem>>, vector<64x10xf32>
      %cst_20 = arith.constant dense<0.000000e+00> : vector<8x10xf32>
      %33 = tpu.matmul %31, %32, %cst_20 {dimension_numbers = #tpu.dot_dimension_numbers<[1], [0], [0], [1], [0, 0, 1, 1], [], []>} : vector<8x64xf32>, vector<64x10xf32>, vector<8x10xf32> -> vector<8x10xf32>
      %c0_21 = arith.constant 0 : index
      %c0_22 = arith.constant 0 : index
      %34 = vector.load %arg7[%c0_21, %c0_22] : memref<1x10xf32, #tpu.memory_space<vmem>>, vector<1x10xf32>
      %35 = vector.broadcast %34 : vector<1x10xf32> to vector<8x10xf32>
      %36 = arith.addf %33, %35 : vector<8x10xf32>
      %cst_23 = arith.constant dense<0xFF800000> : vector<8xf32>
      %37 = vector.multi_reduction <maximumf>, %36, %cst_23 [1] : vector<8x10xf32> to vector<8xf32>
      %38 = vector.shape_cast %37 : vector<8xf32> to vector<8x1xf32>
      %39 = vector.broadcast %38 : vector<8x1xf32> to vector<8x10xf32>
      %40 = arith.subf %36, %39 : vector<8x10xf32>
      %41 = math.exp %40 : vector<8x10xf32>
      %cst_24 = arith.constant dense<0.000000e+00> : vector<8xf32>
      %42 = vector.multi_reduction <add>, %41, %cst_24 [1] : vector<8x10xf32> to vector<8xf32>
      %43 = vector.shape_cast %42 : vector<8xf32> to vector<8x1xf32>
      %44 = math.log %43 : vector<8x1xf32>
      %45 = arith.addf %38, %44 : vector<8x1xf32>
      %46 = tpu.iota {dimensions = array<i32: 1>} : vector<8x10xi32>
      %47 = vector.broadcast %0 : vector<8x1xi32> to vector<8x10xi32>
      %48 = arith.cmpi eq, %46, %47 : vector<8x10xi32>
      %49 = arith.extui %48 : vector<8x10xi1> to vector<8x10xi32>
      %50 = arith.sitofp %49 : vector<8x10xi32> to vector<8x10xf32>
      %51 = arith.mulf %36, %50 : vector<8x10xf32>
      %cst_25 = arith.constant dense<0.000000e+00> : vector<8xf32>
      %52 = vector.multi_reduction <add>, %51, %cst_25 [1] : vector<8x10xf32> to vector<8xf32>
      %53 = vector.shape_cast %52 : vector<8xf32> to vector<8x1xf32>
      %54 = arith.subf %45, %53 : vector<8x1xf32>
      %55 = vector.shape_cast %54 : vector<8x1xf32> to vector<1x8x1xf32>
      %cst_26 = arith.constant dense<0.000000e+00> : vector<1xf32>
      %56 = vector.multi_reduction <add>, %55, %cst_26 [1, 2] : vector<1x8x1xf32> to vector<1xf32>
      %57 = vector.shape_cast %56 : vector<1xf32> to vector<1x1x1xf32>
      %58 = vector.extract %57[0, 0, 0] : f32 from vector<1x1x1xf32>
      %59 = vector.broadcast %58 : f32 to vector<1x1xf32>
      %cst_27 = arith.constant 1.250000e-01 : f32
      %60 = vector.broadcast %cst_27 : f32 to vector<1x1xf32>
      %61 = arith.mulf %59, %60 : vector<1x1xf32>
      %62 = vector.broadcast %38 : vector<8x1xf32> to vector<8x10xf32>
      %63 = arith.cmpf oeq, %36, %62 : vector<8x10xf32>
      %c10_i32 = arith.constant 10 : i32
      %64 = vector.broadcast %c10_i32 : i32 to vector<8x10xi32>
      %65 = arith.select %63, %46, %64 : vector<8x10xi1>, vector<8x10xi32>
      %cst_28 = arith.constant dense<2147483647> : vector<8xi32>
      %66 = vector.multi_reduction <minsi>, %65, %cst_28 [1] : vector<8x10xi32> to vector<8xi32>
      %67 = vector.shape_cast %66 : vector<8xi32> to vector<8x1xi32>
      %68 = arith.cmpi eq, %67, %0 : vector<8x1xi32>
      %69 = arith.extui %68 : vector<8x1xi1> to vector<8x1xi32>
      %70 = arith.sitofp %69 : vector<8x1xi32> to vector<8x1xf32>
      %71 = vector.shape_cast %70 : vector<8x1xf32> to vector<1x8x1xf32>
      %cst_29 = arith.constant dense<0.000000e+00> : vector<1xf32>
      %72 = vector.multi_reduction <add>, %71, %cst_29 [1, 2] : vector<1x8x1xf32> to vector<1xf32>
      %73 = vector.shape_cast %72 : vector<1xf32> to vector<1x1x1xf32>
      %74 = vector.extract %73[0, 0, 0] : f32 from vector<1x1x1xf32>
      %75 = vector.broadcast %74 : f32 to vector<1x1xf32>
      %cst_30 = arith.constant 1.250000e-01 : f32
      %76 = vector.broadcast %cst_30 : f32 to vector<1x1xf32>
      %77 = arith.mulf %75, %76 : vector<1x1xf32>
      %78 = vector.broadcast %61 : vector<1x1xf32> to vector<1x128xf32>
      %79 = arith.mulf %78, %5 : vector<1x128xf32>
      %80 = vector.broadcast %77 : vector<1x1xf32> to vector<1x128xf32>
      %81 = arith.mulf %80, %9 : vector<1x128xf32>
      %82 = arith.addf %79, %81 : vector<1x128xf32>
      %c0_31 = arith.constant 0 : index
      %c1 = arith.constant 1 : index
      %c0_32 = arith.constant 0 : index
      %83 = vector.load %arg8[%c0_31, %c1, %c0_32] : memref<1x8x128xf32, #tpu.memory_space<vmem>>, vector<1x1x128xf32>
      %84 = vector.shape_cast %83 : vector<1x1x128xf32> to vector<1x128xf32>
      %85 = vector.shape_cast %82 : vector<1x128xf32> to vector<1x1x128xf32>
      tpu.vector_store %arg8[%c0_31, %c1, %c0_32], %85 {strides = array<i32>} : memref<1x8x128xf32, #tpu.memory_space<vmem>>, vector<1x1x128xf32>,
    } else {
    }
    %c0_8 = arith.constant 0 : index
    %c0_9 = arith.constant 0 : index
    %c0_10 = arith.constant 0 : index
    %20 = vector.load %arg8[%c0_8, %c0_9, %c0_10] : memref<1x8x128xf32, #tpu.memory_space<vmem>>, vector<1x8x128xf32>
    %21 = vector.shape_cast %20 : vector<1x8x128xf32> to vector<8x128xf32>
    %cst_11 = arith.constant dense<0.000000e+00> : vector<128xf32>
    %22 = vector.multi_reduction <add>, %21, %cst_11 [0] : vector<8x128xf32> to vector<128xf32>
    %23 = vector.shape_cast %22 : vector<128xf32> to vector<1x128xf32>
    %cst_12 = arith.constant 5.000000e-01 : f32
    %24 = vector.broadcast %cst_12 : f32 to vector<1x128xf32>
    %25 = arith.mulf %23, %24 : vector<1x128xf32>
    %c0_13 = arith.constant 0 : index
    %c2 = arith.constant 2 : index
    %c0_14 = arith.constant 0 : index
    %26 = vector.load %arg8[%c0_13, %c2, %c0_14] : memref<1x8x128xf32, #tpu.memory_space<vmem>>, vector<1x1x128xf32>
    %27 = vector.shape_cast %26 : vector<1x1x128xf32> to vector<1x128xf32>
    %28 = vector.shape_cast %25 : vector<1x128xf32> to vector<1x1x128xf32>
    tpu.vector_store %arg8[%c0_13, %c2, %c0_14], %28 {strides = array<i32>} : memref<1x8x128xf32, #tpu.memory_space<vmem>>, vector<1x1x128xf32>,
    return
  }
  func.func @transform_0(%arg0: i32) -> (i32, i32) {
    %c0_i32 = arith.constant 0 : i32
    %c0_i32_0 = arith.constant 0 : i32
    %c0_i32_1 = arith.constant 0 : i32
    return %c0_i32, %c0_i32_0 : i32, i32
  }
  func.func @transform_1(%arg0: i32) -> (i32, i32) {
    %c0_i32 = arith.constant 0 : i32
    %c0_i32_0 = arith.constant 0 : i32
    %c0_i32_1 = arith.constant 0 : i32
    return %c0_i32, %c0_i32_0 : i32, i32
  }
  func.func @transform_2(%arg0: i32) -> (i32, i32) {
    %c0_i32 = arith.constant 0 : i32
    %c0_i32_0 = arith.constant 0 : i32
    %c0_i32_1 = arith.constant 0 : i32
    return %c0_i32, %c0_i32_0 : i32, i32
  }
  func.func @transform_3(%arg0: i32) -> (i32, i32) {
    %c0_i32 = arith.constant 0 : i32
    %c0_i32_0 = arith.constant 0 : i32
    %c0_i32_1 = arith.constant 0 : i32
    return %c0_i32, %c0_i32_0 : i32, i32
  }
  func.func @transform_4(%arg0: i32) -> (i32, i32) {
    %c0_i32 = arith.constant 0 : i32
    %c0_i32_0 = arith.constant 0 : i32
    %c0_i32_1 = arith.constant 0 : i32
    return %c0_i32, %c0_i32_0 : i32, i32
  }
  func.func @transform_5(%arg0: i32) -> (i32, i32) {
    %c0_i32 = arith.constant 0 : i32
    %c0_i32_0 = arith.constant 0 : i32
    %c0_i32_1 = arith.constant 0 : i32
    return %c0_i32, %c0_i32_0 : i32, i32
  }
  func.func @transform_6(%arg0: i32) -> (i32, i32) {
    %c0_i32 = arith.constant 0 : i32
    %c0_i32_0 = arith.constant 0 : i32
    %c0_i32_1 = arith.constant 0 : i32
    return %c0_i32, %c0_i32_0 : i32, i32
  }
  func.func @transform_7(%arg0: i32) -> (i32, i32, i32) {
    %c0_i32 = arith.constant 0 : i32
    %c0_i32_0 = arith.constant 0 : i32
    %c0_i32_1 = arith.constant 0 : i32
    return %arg0, %c0_i32, %c0_i32_0 : i32, i32, i32
  }
}

</mosaic_0001>

<bundles_post_ra>
// kernel: tpu_custom_call.1
= control target key start
LH: loop header
LB: loop body
LE: loop exit
PB: predicated region body
PF: predicated region fallthrough
CT: control target
= control target key end

     0   :  { %12 = vsyncpa [#allocation3], 0  ;;  %s933_s0 = inlined_call_operand.vmem [shape: s32[8,1], index: 0, kind: input, shape index: {}]   ;;  %s934_s1 = inlined_call_operand.vmem [shape: f32[8,32], index: 1, kind: input, shape index: {}]   ;;  %s935_s2 = inlined_call_operand.vmem [shape: f32[32,10], index: 2, kind: input, shape index: {}]   ;;  %s936_s3 = inlined_call_operand.vmem [shape: f32[1,10], index: 3, kind: input, shape index: {}]   ;;  %s937_s4 = inlined_call_operand.vmem [shape: f32[8,64], index: 4, kind: input, shape index: {}]   ;;  %s938_s5 = inlined_call_operand.vmem [shape: f32[64,10], index: 5, kind: input, shape index: {}]   ;;  %s939_s6 = inlined_call_operand.vmem [shape: f32[1,10], index: 6, kind: input, shape index: {}]   ;;  %s940_s7 = inlined_call_operand.hbm [shape: f32[2,8,128], index: 7, kind: output, shape index: {}]  }
   0x1   :  { %14 = vsyncpa [#allocation3 + $0x1], 0  ;;  %s758_s24 = smov 0   ;;  %s760_s25 = smov 0  }
   0x2   :  { %s762_s26 = smov 0   ;;  %s764_s27 = smov 0  }
   0x3 LB: > { %s779_s28 = sadd.s32 4294967295, %s711_s27   ;;  %s565_s29 = sadd.s32 4294967294, %s711_s27   ;;  %s711_s27 = sphi %s764_s27, %s946_s27   ;;  %s707_s26 = sphi %s762_s26, %s945_s26   ;;  %s703_s25 = sphi %s760_s25, %s944_s25   ;;  %s699_s24 = sphi %s758_s24, %s943_s24  }
   0x4   : > { %s783_s30 = sadd.s32 1, %s711_s27   ;;  %s174_s8 = sadd.s32 1, %s707_s26 }
   0x5   : > { %s171_s9 = ssub.s32 %s711_s27, %s783_s30  ;;  %p184_p0 = scmp.ne.s32.totalorder %s707_s26, %s703_s25 }
   0x6   : > { %p172_p1 = scmp.eq.s32.totalorder %s171_s9, 0  ;;  %p185_p2 = scmp.eq.s32.totalorder %s779_s28, 1 }
   0x7   : > { %p190_p3 = scmp.ne.s32.totalorder %s703_s25, %s699_s24  ;;  %p191_p4 = scmp.eq.s32.totalorder %s565_s29, 1 }
   0x8   : > { %s794_s10 = scalar_select %p172_p1, %s707_s26, %s174_s8  }
   0x9   : > { %p796_p5 = por %p185_p2, %p184_p0  ;;  %p800_p6 = por %p191_p4, %p190_p3 }
   0xa   : > { %p567_p7 = scmp.ge.s32.totalorder %s711_s27, 1  ;;  %p230_p8 = scmp.lt.s32.totalorder %s711_s27, 3 }
   0xc   : > { %p231_p9 = pnand %p567_p7, %p230_p8 }
   0xd   : > { %s254_s13 = sand.u32 (!%p231_p9), 1, %s703_s25   ;;  %p571_p10 = scmp.ne.s32.totalorder (!%p231_p9), %s779_s28, 0 }
   0xe   : > { %234 = sbr.rel (%p231_p9) target bundleno = 1448 (0x5a8), region = 48  ;;  %s568_s16 = sshll.u32 (!%p231_p9), %s254_s13, 3 }
   0xf   : > { %s816_s17 = scalar_lea.vmem (!%p231_p9), [#allocation2], %s568_s16 }
  0x13   : > { %v810_v0 = vld [vmem:[%s933_s0] sm:$0xff]  ;;  %v258_v1 = vlaneseq  ;;  %v713_v3 = vmov 0.0  }
  0x14   : > { %266 = vst [vmem:[%s816_s17] sm:$0xff] %v713_v3  ;;  %270 = sbr.rel (%p571_p10) target bundleno = 717 (0x2cd), region = 52 }
  0x15   : > { %v814_v2 = vand.u32 127, %v258_v1 }
  0x17   : > { %vm260_vm0 = vcmp.eq.s32.totalorder %v814_v2, 0  ;;  %vm263_vm1 = vcmp.eq.s32.totalorder %v814_v2, 1 }
  0x18   : > { %v821_v4 = vsel %vm260_vm0, 1.0, %v713_v3  ;;  %v823_v5 = vsel %vm263_vm1, 1.0, %v713_v3 }
  0x19   : > { %v276_v6 = vld [vmem:[%s935_s2 + $0x18] sm:$0xff]  ;;  %v275_v7 = vld [vmem:[%s935_s2 + $0x10] sm:$0xff]  ;;  %v271_v8 = vld [vmem:[%s934_s1] sm:$0xff]  ;;  %v714_v9 = vmov 0   ;;  %vm281_vm2 = vcmask 261120   ;;  %vm305_vm3 = vcmask 80896  }
  0x1a   : > { %297 = vmatpush.msra.mxu0 %v276_v6  ;;  %635 = vset.pattern.permute.xlu1 %v714_v9  ;;  %v274_v10 = vld [vmem:[%s935_s2 + $0x8] sm:$0xff]  ;;  %v273_v11 = vld [vmem:[%s935_s2] sm:$0xff]  ;;  %v272_v12 = vmax.f32 %v271_v8, 0.0  ;;  %v715_v31 = vmov 0.0   ;;  %vm329_vm7 = vcmask 7168  }
  0x1b   : > { %319 = vperm.xlu1 %635, %v810_v0   ;;  %636 = vset.pattern.permute.xlu0 %v714_v9  ;;  %v637_v13 = vld [vmem:[%s936_s3] ss:$0 sm:$0xff] }
  0x1c   : > { %298 = vmatpush.msra.mxu0 %v275_v7 }
  0x1e   : > { %299 = vmatpush.msra.mxu0 %v274_v10 }
  0x20   : > { %300 = vmatpush.msra.mxu0 %v273_v11 }
  0x21   : > { %572 = vmatmul.msk.f32.vlgmr.msra.gmra.mxu0 %vm281_vm2, %v272_v12 }
  0x8d   : > { %v320_v27 = vpop.permute.xlu1 %319 }
  0x8e   : > { %vm321_vm5 = vcmp.eq.s32.totalorder %v814_v2, %v320_v27 }
  0x8f   : > { %v573_v32 = vsel %vm321_vm5, 1.0, %v715_v31 }
  0x9e   : > { %v302_v14 = vpop.f32.mrf.mxu0 }
  0x9f   : > { %v303_v15 = vadd.f32 %v637_v13, %v302_v14 }
  0xa1   : > { %v306_v16 = vsel %vm305_vm3, %v303_v15, -inf  ;;  %v324_v33 = vmul.f32 %v573_v32, %v303_v15 }
  0xa2   : > { %307 = vmax.xlane.f32.xlu0 %v306_v16 }
  0xa3   : > { %v325_v34 = vsel %vm305_vm3, %v324_v33, 0.0 }
 0x115   : > { %v308_v17 = vpop.xlane.xlu0 %307 }
 0x116   : > { %v309_v18 = vsub.f32 %v303_v15, %v308_v17  ;;  %vm342_vm4 = vcmp.eq.f32.partialorder %v303_v15, %v308_v17 }
 0x117   : > { %v343_v19 = vsel %vm342_vm4, %v814_v2, 10 }
 0x118   : > { %v310_v20 = vmul.f32 1.442695, %v309_v18  ;;  %v344_v21 = vsel %vm305_vm3, %v343_v19, 2147483647 }
 0x119   : > { %v346_v22 = vshra.s32 %v344_v21, 16  ;;  %v345_v26 = vand.u32 65535, %v344_v21 }
 0x11a   : > { %638 = vpow2.f32 %v310_v20 }
 0x11b   : > { %v348_v23 = vcvt.s32.f32 %v346_v22  ;;  %v347_v29 = vcvt.s32.f32 %v345_v26 }
 0x11d   : > { %349 = vmin.xlane.f32.xlu0 %v348_v23 }
 0x120   : > { %v639_v24 = vpop.eup %638 }
 0x121   : > { %v312_v25 = vsel %vm305_vm3, %v639_v24, 0.0 }
 0x122   : > { %313 = vadd.xlane.f32.xlu1 %v312_v25 }
 0x190   : > { %v350_v28 = vpop.xlane.xlu0 %349 }
 0x191   : > { %vm351_vm6 = vcmp.eq.f32.partialorder %v348_v23, %v350_v28  ;;  %v356_v36 = vcvt.f32.s32 %v350_v28 }
 0x192   : > { %v352_v30 = vsel %vm351_vm6, %v347_v29, inf }
 0x193   : > { %353 = vmin.xlane.f32.xlu2 %v352_v30  ;;  %v357_v39 = vshll.u32 %v356_v36, 16 }
 0x195   : > { %v314_v35 = vpop.xlane.xlu1 %313 }
 0x196   : > { %640 = vlog2.f32 %v314_v35 }
 0x19b   : > { %326 = vadd.xlane.f32.xlu2 %v325_v34 }
 0x19c   : > { %v641_v37 = vpop.eup %640 }
 0x19d   : > { %v316_v41 = vmul.f32 0.6931472, %v641_v37 }
 0x19f   : > { %v317_v45 = vadd.f32 %v316_v41, %v308_v17 }
 0x206   : > { %v354_v38 = vpop.xlane.xlu2 %353 }
 0x207   : > { %v355_v40 = vcvt.f32.s32 %v354_v38 }
 0x209   : > { %v358_v42 = vadd.s32 %v357_v39, %v355_v40 }
 0x20b   : > { %vm359_vm8 = vcmp.eq.s32.totalorder %v358_v42, %v810_v0 }
 0x20c   : > { %v574_v43 = vsel %vm359_vm8, 1.0, %v715_v31 }
 0x20d   : > { %v362_v44 = vsel %vm329_vm7, %v574_v43, 0.0 }
 0x20e   : > { %363 = vadd.xlane.f32.xlu2 %v362_v44  ;;  %v327_v46 = vpop.xlane.xlu2 %326 }
 0x20f   : > { %v328_v47 = vsub.f32 %v317_v45, %v327_v46 }
 0x211   : > { %v330_v48 = vsel %vm329_vm7, %v328_v47, 0.0 }
 0x212   : > { %331 = vadd.xlane.f32.xlu0 %v330_v48 }
 0x281   : > { %v364_v49 = vpop.xlane.xlu2 %363 }
 0x282   : > { %v365_v50 = vrot.slane %v364_v49, 4 }
 0x284   : > { %v366_v51 = vadd.f32 %v365_v50, %v364_v49 }
 0x285   : > { %v332_v52 = vpop.xlane.xlu0 %331 }
 0x286   : > { %v367_v53 = vrot.slane %v366_v51, 2  ;;  %v333_v54 = vrot.slane %v332_v52, 4 }
 0x288   : > { %v334_v55 = vadd.f32 %v333_v54, %v332_v52  ;;  %v368_v56 = vadd.f32 %v367_v53, %v366_v51 }
 0x28a   : > { %v335_v57 = vrot.slane %v334_v55, 2  ;;  %v369_v59 = vrot.slane %v368_v56, 1 }
 0x28c   : > { %v336_v58 = vadd.f32 %v335_v57, %v334_v55  ;;  %v370_v62 = vadd.f32 %v369_v59, %v368_v56 }
 0x28e   : > { %v337_v60 = vrot.slane %v336_v58, 1 }
 0x290   : > { %v338_v61 = vadd.f32 %v337_v60, %v336_v58 }
 0x292   : > { %583 = vpush %v338_v61 }
 0x293   : > { %585 = vpush %v370_v62 }
 0x2c3   : > { %s584_s18 = spop %583 }
 0x2c4   : > { %v340_v63 = vstv %s584_s18  ;;  %s586_s19 = spop %585 }
 0x2c5   : > { %v341_v1 = vmul.f32 0.125, %v340_v63  ;;  %v372_v3 = vstv %s586_s19 }
 0x2c6   : > { %v373_v6 = vmul.f32 0.125, %v372_v3 }
 0x2c7   : > { %v374_v7 = vmul.f32 %v821_v4, %v341_v1 }
 0x2c8   : > { %v375_v8 = vmul.f32 %v823_v5, %v373_v6 }
 0x2ca   : > { %v376_v9 = vadd.f32 %v375_v8, %v374_v7 }
 0x2cc   : > { %377 = vst [vmem:[%s816_s17] sm:$0x1] %v376_v9 }
 0x2cd PF: > { %p575_p11 = scmp.ne.s32.totalorder %s779_s28, 1 }
 0x2cf   : > { %381 = sbr.rel (%p575_p11) target bundleno = 1424 (0x590), region = 56 }
 0x2d4   : > { %v391_v10 = vld [vmem:[%s938_s5 + $0x38] sm:$0xff]  ;;  %v390_v11 = vld [vmem:[%s938_s5 + $0x30] sm:$0xff]  ;;  %v716_v12 = vmov 0   ;;  %v389_v13 = vld [vmem:[%s938_s5 + $0x28] sm:$0xff]  ;;  %vm396_vm9 = vcmask 523264   ;;  %vm420_vm10 = vcmask 80896  }
 0x2d5   : > { %408 = vmatpush.msra.mxu0 %v391_v10  ;;  %642 = vset.pattern.permute.xlu1 %v716_v12  ;;  %v388_v14 = vld [vmem:[%s938_s5 + $0x20] sm:$0xff]  ;;  %v387_v15 = vld [vmem:[%s938_s5 + $0x18] sm:$0xff]  ;;  %v386_v16 = vld [vmem:[%s938_s5 + $0x10] sm:$0xff]  ;;  %v717_v39 = vmov 0.0   ;;  %vm444_vm14 = vcmask 7168  }
 0x2d6   : > { %434 = vperm.xlu1 %642, %v810_v0   ;;  %643 = vset.pattern.permute.xlu0 %v716_v12  ;;  %v382_v17 = vld [vmem:[%s937_s4] sm:$0xff]  ;;  %v385_v18 = vld [vmem:[%s938_s5 + $0x8] sm:$0xff] }
 0x2d7   : > { %409 = vmatpush.msra.mxu0 %v390_v11  ;;  %v384_v19 = vld [vmem:[%s938_s5] sm:$0xff]  ;;  %v383_v20 = vmax.f32 %v382_v17, 0.0 }
 0x2d8   : > { %v644_v21 = vld [vmem:[%s939_s6] ss:$0 sm:$0xff] }
 0x2d9   : > { %410 = vmatpush.msra.mxu0 %v389_v13 }
 0x2db   : > { %411 = vmatpush.msra.mxu0 %v388_v14 }
 0x2dd   : > { %412 = vmatpush.msra.mxu0 %v387_v15 }
 0x2df   : > { %413 = vmatpush.msra.mxu0 %v386_v16 }
 0x2e1   : > { %414 = vmatpush.msra.mxu0 %v385_v18 }
 0x2e3   : > { %415 = vmatpush.msra.mxu0 %v384_v19 }
 0x2e4   : > { %576 = vmatmul.msk.f32.vlgmr.msra.gmra.mxu0 %vm396_vm9, %v383_v20 }
 0x348   : > { %v435_v35 = vpop.permute.xlu1 %434 }
 0x349   : > { %vm436_vm12 = vcmp.eq.s32.totalorder %v814_v2, %v435_v35 }
 0x34a   : > { %v577_v40 = vsel %vm436_vm12, 1.0, %v717_v39 }
 0x361   : > { %v417_v22 = vpop.f32.mrf.mxu0 }
 0x362   : > { %v418_v23 = vadd.f32 %v644_v21, %v417_v22 }
 0x364   : > { %v421_v24 = vsel %vm420_vm10, %v418_v23, -inf  ;;  %v439_v41 = vmul.f32 %v577_v40, %v418_v23 }
 0x365   : > { %422 = vmax.xlane.f32.xlu0 %v421_v24 }
 0x366   : > { %v440_v42 = vsel %vm420_vm10, %v439_v41, 0.0 }
 0x3d8   : > { %v423_v25 = vpop.xlane.xlu0 %422 }
 0x3d9   : > { %v424_v26 = vsub.f32 %v418_v23, %v423_v25  ;;  %vm457_vm11 = vcmp.eq.f32.partialorder %v418_v23, %v423_v25 }
 0x3da   : > { %v458_v27 = vsel %vm457_vm11, %v814_v2, 10 }
 0x3db   : > { %v425_v28 = vmul.f32 1.442695, %v424_v26  ;;  %v459_v29 = vsel %vm420_vm10, %v458_v27, 2147483647 }
 0x3dc   : > { %v461_v30 = vshra.s32 %v459_v29, 16  ;;  %v460_v34 = vand.u32 65535, %v459_v29 }
 0x3dd   : > { %645 = vpow2.f32 %v425_v28 }
 0x3de   : > { %v463_v31 = vcvt.s32.f32 %v461_v30  ;;  %v462_v37 = vcvt.s32.f32 %v460_v34 }
 0x3e0   : > { %464 = vmin.xlane.f32.xlu0 %v463_v31 }
 0x3e3   : > { %v646_v32 = vpop.eup %645 }
 0x3e4   : > { %v427_v33 = vsel %vm420_vm10, %v646_v32, 0.0 }
 0x3e5   : > { %428 = vadd.xlane.f32.xlu1 %v427_v33 }
 0x453   : > { %v465_v36 = vpop.xlane.xlu0 %464 }
 0x454   : > { %vm466_vm13 = vcmp.eq.f32.partialorder %v463_v31, %v465_v36  ;;  %v471_v44 = vcvt.f32.s32 %v465_v36 }
 0x455   : > { %v467_v38 = vsel %vm466_vm13, %v462_v37, inf }
 0x456   : > { %468 = vmin.xlane.f32.xlu2 %v467_v38  ;;  %v472_v47 = vshll.u32 %v471_v44, 16 }
 0x458   : > { %v429_v43 = vpop.xlane.xlu1 %428 }
 0x459   : > { %647 = vlog2.f32 %v429_v43 }
 0x45e   : > { %441 = vadd.xlane.f32.xlu2 %v440_v42 }
 0x45f   : > { %v648_v45 = vpop.eup %647 }
 0x460   : > { %v431_v49 = vmul.f32 0.6931472, %v648_v45 }
 0x462   : > { %v432_v52 = vadd.f32 %v431_v49, %v423_v25 }
 0x4c9   : > { %v469_v46 = vpop.xlane.xlu2 %468 }
 0x4ca   : > { %v470_v48 = vcvt.f32.s32 %v469_v46 }
 0x4cc   : > { %v473_v2 = vadd.s32 %v472_v47, %v470_v48 }
 0x4ce   : > { %vm474_vm15 = vcmp.eq.s32.totalorder %v473_v2, %v810_v0 }
 0x4cf   : > { %v578_v50 = vsel %vm474_vm15, 1.0, %v717_v39 }
 0x4d0   : > { %v477_v51 = vsel %vm444_vm14, %v578_v50, 0.0 }
 0x4d1   : > { %478 = vadd.xlane.f32.xlu2 %v477_v51  ;;  %v442_v53 = vpop.xlane.xlu2 %441 }
 0x4d2   : > { %v443_v54 = vsub.f32 %v432_v52, %v442_v53 }
 0x4d4   : > { %v445_v55 = vsel %vm444_vm14, %v443_v54, 0.0 }
 0x4d5   : > { %446 = vadd.xlane.f32.xlu0 %v445_v55 }
 0x544   : > { %v479_v56 = vpop.xlane.xlu2 %478 }
 0x545   : > { %v480_v57 = vrot.slane %v479_v56, 4 }
 0x547   : > { %v481_v58 = vadd.f32 %v480_v57, %v479_v56 }
 0x548   : > { %v447_v59 = vpop.xlane.xlu0 %446 }
 0x549   : > { %v482_v60 = vrot.slane %v481_v58, 2  ;;  %v448_v61 = vrot.slane %v447_v59, 4 }
 0x54b   : > { %v449_v62 = vadd.f32 %v448_v61, %v447_v59  ;;  %v483_v63 = vadd.f32 %v482_v60, %v481_v58 }
 0x54d   : > { %v450_v1 = vrot.slane %v449_v62, 2  ;;  %v484_v0 = vrot.slane %v483_v63, 1 }
 0x54f   : > { %v451_v3 = vadd.f32 %v450_v1, %v449_v62  ;;  %v485_v8 = vadd.f32 %v484_v0, %v483_v63 }
 0x551   : > { %v452_v6 = vrot.slane %v451_v3, 1 }
 0x553   : > { %v453_v7 = vadd.f32 %v452_v6, %v451_v3 }
 0x555   : > { %587 = vpush %v453_v7 }
 0x556   : > { %589 = vpush %v485_v8 }
 0x586   : > { %s588_s15 = spop %587 }
 0x587   : > { %v455_v9 = vstv %s588_s15  ;;  %s590_s16 = spop %589 }
 0x588   : > { %v456_v10 = vmul.f32 0.125, %v455_v9  ;;  %v487_v11 = vstv %s590_s16 }
 0x589   : > { %v488_v12 = vmul.f32 0.125, %v487_v11 }
 0x58a   : > { %v489_v13 = vmul.f32 %v821_v4, %v456_v10 }
 0x58b   : > { %v490_v14 = vmul.f32 %v823_v5, %v488_v12 }
 0x58d   : > { %v491_v15 = vadd.f32 %v490_v14, %v489_v13 }
 0x58f   : > { %492 = vst [vmem:[%s816_s17 + $0x1] sm:$0x1] %v491_v15 }
 0x590 PF: > { %s580_s18 = sshll.u32 %s779_s28, 3  ;;  %s515_s22 = sshll.u32 %s816_s17, 4  ;;  %s516_s22 = int_to_ptr.vmem [resolvable:$true] %s515_s22 }
 0x591   : > { %s513_s21 = scalar_lea.hbm %s940_s7, %s580_s18  ;;  %s503_s29 = scalar_lea.sflag [#allocation3], %s254_s13 }
 0x592   : > { %s517_s23 = sshll.u32 %s513_s21, 4  ;;  %s669_s15 = scalar_lea.hbm %s940_s7, 16  ;;  %s518_s23 = int_to_ptr.hbm [resolvable:$true] %s517_s23 }
 0x593   : > { %s663_s8 = sshra.s32 %s518_s23, 4  ;;  %s664_s8 = int_to_ptr.hbm [resolvable:$true] %s663_s8 }
 0x594   : > { %s665_s28 = scalar_lea.hbm %s664_s8, 8  ;;  %p670_p1 = scmp.lt.s32.totalorder %s664_s8, %s940_s7 }
 0x595   : > { %p666_p12 = scmp.ne.s32.totalorder %s664_s8, %s665_s28  ;;  %p671_p2 = scmp.lt.s32.totalorder %s669_s15, %s665_s28 }
 0x596   : > { %v493_v16 = vld [vmem:[%s816_s17] sm:$0xff] }
 0x597   : > { %v494_v17 = vrot.slane %v493_v16, 4  ;;  %p667_p13 = pnand %p666_p12, %p796_p5  ;;  %p672_p3 = por %p671_p2, %p670_p1 }
 0x599   : > { %v495_v18 = vadd.f32 %v494_v17, %v493_v16  ;;  %p668_p0 = pneg %p667_p13 }
 0x59b   : > { %v496_v19 = vrot.slane %v495_v18, 2  ;;  %p673_p4 = pnand %p672_p3, %p668_p0 }
 0x59d   : > { %v497_v20 = vadd.f32 %v496_v19, %v495_v18 }
 0x59f   : > { %v498_v4 = vrot.slane %v497_v20, 1 }
 0x5a1   : > { %v499_v5 = vadd.f32 %v498_v4, %v497_v20 }
 0x5a3   : > { %v500_v21 = vmul.f32 0.5, %v499_v5 }
 0x5a5   : > { %501 = vst [vmem:[%s816_s17 + $0x2] sm:$0x1] %v500_v21 }
 0x5a6   : > { %676 = shalt.err (!%p673_p4)
}
 0x5a7   : > { %591 = dma.vmem_to_hbm [thread:$0]  (%p796_p5), %s516_s22, 128, %s518_s23, %s503_s29  }
 0x5a8 PF: > { %p597_p7 = scmp.ge.s32.totalorder %s711_s27, 2  ;;  %s529_s13 = sand.u32 1, %s699_s24  }
 0x5a9   : > { %s530_s17 = scalar_lea.sflag [#allocation3], %s529_s13 }
 0x5aa   : > { %p594_p8 = pnand %p597_p7, %p800_p6 }
 0x5ac   : > { %p595_p9 = pneg %p594_p8 }
 0x5ae   : > { %694 = dma.done.wait (%p595_p9), %s530_s17, 128  }
 0x5af   : > { %696 = vsyncadd (%p595_p9), %s530_s17, 4294967168  ;;  %p17_p10 = scmp.ge.s32.totalorder %s783_s30, 4   ;;  %s943_s24 = smov %s703_s25 }
 0x5b0   : > { %s944_s25 = smov %s707_s26  ;;  %s945_s26 = smov %s794_s10 }
 0x5b1   : > { %s946_s27 = smov %s783_s30  ;;  %19 = sbr.rel (!%p17_p10) target bundleno = 3 (0x3), region = 88 }
 0x5b6   :  { %536 = vsyncpa [#allocation3], 1 }
 0x5b7   :  { %538 = vsyncpa [#allocation3 + $0x1], 1 }

</bundles_post_ra>
